<compile_context>
chip_gen: v6e
topology: v6e:2x2x1
jax: 0.10.0
libtpu: 0.0.40
codegen_flags: <defaults>
</compile_context>

<pallas_src>
import jax
import jax.numpy as jnp
from jax.experimental import pallas as pl
from jax.experimental.pallas import tpu as pltpu

LANE = 128
SUBLANE = 8
VMEM_BUDGET = 48 * 1024 * 1024  # conservative target; fits v7x's 64 MiB/TC


def _round_up(n, m):
    return ((n + m - 1) // m) * m


# --------------------------------------------------------------------------
# Kernel
# --------------------------------------------------------------------------
def mlp_kernel(x_ref, w1_ref, b1_ref, w2_ref, b2_ref, o_ref):
    # Cast the activation tile to bf16 in VMEM (x streams from HBM at its
    # native dtype; no wrapper-side cast/pad copy).
    x = x_ref[...].astype(w1_ref.dtype)
    # Hidden layer: bf16 MXU matmul with f32 accumulation; bias + ReLU in f32.
    h = jnp.dot(x, w1_ref[...], preferred_element_type=jnp.float32)
    h = jnp.maximum(h + b1_ref[...], 0.0)
    # Output layer: downcast hidden activations for the second MXU pass.
    out = jnp.dot(h.astype(w2_ref.dtype), w2_ref[...],
                  preferred_element_type=jnp.float32)
    o_ref[...] = (out + b2_ref[...]).astype(o_ref.dtype)


# --------------------------------------------------------------------------
# One-time parameter preparation (pad to lane-dense widths + cast), done at
# setup time so the per-call hot path never touches the weights in the wrapper.
# --------------------------------------------------------------------------
def prepare_params(w1, b1, w2, b2, *, lane_align=LANE, weight_dtype=jnp.bfloat16):
    """w1: [D, H]; b1: [1, H] or [H]; w2: [H, C]; b2: [1, C] or [C].
    (weights stored [in, out], i.e. transposed vs. torch nn.Linear.weight)."""
    D, H = w1.shape
    C = w2.shape[1]
    Hp = _round_up(H, lane_align)
    Cp = _round_up(C, lane_align)
    b1 = jnp.reshape(b1, (1, H))
    b2 = jnp.reshape(b2, (1, C))
    return dict(
        w1=jnp.pad(w1.astype(weight_dtype), ((0, 0), (0, Hp - H))),
        b1=jnp.pad(b1.astype(jnp.float32), ((0, 0), (0, Hp - H))),
        w2=jnp.pad(w2.astype(weight_dtype), ((0, Hp - H), (0, Cp - C))),
        b2=jnp.pad(b2.astype(jnp.float32), ((0, 0), (0, Cp - C))),
        num_classes=C,
    )


# --------------------------------------------------------------------------
# VMEM budgeting / batch-tile selection
# --------------------------------------------------------------------------
def _vmem_bytes(tb, D, Hp, Cp, x_isz, w_isz, out_isz, weight_bufs):
    weights = weight_bufs * (D * Hp + Hp * Cp) * w_isz
    biases = weight_bufs * (Hp + Cp) * 4
    x_tile = 2 * tb * D * x_isz          # double-buffered activation tile
    out_tile = 2 * tb * Cp * out_isz     # double-buffered output tile
    h_tmp = tb * Hp * (4 + w_isz)        # f32 hidden temp + its bf16 copy
    return weights + biases + x_tile + out_tile + h_tmp


def _choose_batch_tile(B, batch_tile, D, Hp, Cp, x_isz, w_isz, out_isz,
                       weight_bufs):
    if B <= SUBLANE:
        return B  # single block equal to the (tiny) full batch
    tb = min(batch_tile, _round_up(B, SUBLANE))
    if tb >= B:
        # Guarantee >= 2 grid steps so v7x's two TensorCores both get work.
        tb = _round_up(pl.cdiv(B, 2), SUBLANE)
    # Shrink until the VMEM estimate fits the conservative budget.
    while tb > SUBLANE and _vmem_bytes(tb, D, Hp, Cp, x_isz, w_isz, out_isz,
                                       weight_bufs) > VMEM_BUDGET:
        tb = max(SUBLANE, _round_up(tb // 2, SUBLANE))
    return tb


def _const_spec(shape, mode):
    if mode is None:
        return pl.BlockSpec(shape, lambda i: (0, 0))
    return pl.BlockSpec(shape, lambda i: (0, 0), pipeline_mode=mode)


# --------------------------------------------------------------------------
# Forward pass
# --------------------------------------------------------------------------
def mlp_classifier(x, params, *, batch_tile=256, out_dtype=jnp.float32,
                   single_buffer_weights=True):
    """x: [B, input_dim]; params: output of prepare_params().
    Returns logits [B, num_classes] in out_dtype (f32 by default)."""
    w1, b1, w2, b2 = params["w1"], params["b1"], params["w2"], params["b2"]
    C = params["num_classes"]
    B, D = x.shape
    Dw, Hp = w1.shape
    Cp = w2.shape[1]
    assert D == Dw, "input_dim mismatch between x and prepared weights"

    weight_bufs = 1 if single_buffer_weights else 2
    out_isz = jnp.dtype(out_dtype).itemsize
    TB = _choose_batch_tile(B, batch_tile, D, Hp, Cp, x.dtype.itemsize,
                            w1.dtype.itemsize, out_isz, weight_bufs)
    grid = (pl.cdiv(B, TB),)
    weight_mode = pl.Buffered(1) if single_buffer_weights else None

    vmem_est = _vmem_bytes(TB, D, Hp, Cp, x.dtype.itemsize, w1.dtype.itemsize,
                           out_isz, weight_bufs)
    vmem_limit = int(min(max(int(vmem_est * 1.25) + (4 << 20), 32 << 20),
                         100 << 20))

    cost = pl.CostEstimate(
        flops=2 * B * (D * Hp + Hp * Cp),
        transcendentals=0,
        bytes_accessed=(B * D * x.dtype.itemsize
                        + (D * Hp + Hp * Cp) * w1.dtype.itemsize
                        + (Hp + Cp) * 4
                        + B * Cp * out_isz),
    )

    out_padded = pl.pallas_call(
        mlp_kernel,
        out_shape=jax.ShapeDtypeStruct((B, Cp), out_dtype),
        grid_spec=pltpu.PrefetchScalarGridSpec(
            num_scalar_prefetch=0,
            grid=grid,
            in_specs=[
                pl.BlockSpec((TB, D), lambda i: (i, 0)),    # x: streamed over B
                _const_spec((D, Hp), weight_mode),          # W1: resident
                _const_spec((1, Hp), weight_mode),          # b1: resident
                _const_spec((Hp, Cp), weight_mode),         # W2: resident
                _const_spec((1, Cp), weight_mode),          # b2: resident
            ],
            out_specs=pl.BlockSpec((TB, Cp), lambda i: (i, 0)),
        ),
        compiler_params=pltpu.CompilerParams(
            dimension_semantics=("parallel",),   # shard batch steps across TCs
            vmem_limit_bytes=vmem_limit,
        ),
        cost_estimate=cost,
    )(x, w1, b1, w2, b2)

    return out_padded if Cp == C else out_padded[:, :C]


# --------------------------------------------------------------------------
# Deterministic init mimicking nn.Linear's U(-1/sqrt(fan_in), 1/sqrt(fan_in)).
# Weights stored as [in, out] (transposed vs. PyTorch).
# --------------------------------------------------------------------------
def init_params(key, input_dim, hidden_dim, num_classes):
    k1, k2, k3, k4 = jax.random.split(key, 4)
    bound1 = 1.0 / jnp.sqrt(input_dim)
    bound2 = 1.0 / jnp.sqrt(hidden_dim)
    w1 = jax.random.uniform(k1, (input_dim, hidden_dim), jnp.float32,
                            -bound1, bound1)
    b1 = jax.random.uniform(k2, (1, hidden_dim), jnp.float32, -bound1, bound1)
    w2 = jax.random.uniform(k3, (hidden_dim, num_classes), jnp.float32,
                            -bound2, bound2)
    b2 = jax.random.uniform(k4, (1, num_classes), jnp.float32, -bound2, bound2)
    return w1, b1, w2, b2


if __name__ == "__main__":
    batch = 8
    input_dim = 32
    hidden_dim = 32
    num_classes = 16

    key = jax.random.PRNGKey(0)
    kx, kp = jax.random.split(key)
    x = jax.random.normal(kx, (batch, input_dim), jnp.float32)
    w1, b1, w2, b2 = init_params(kp, input_dim, hidden_dim, num_classes)
    params = prepare_params(w1, b1, w2, b2)   # one-time pad + cast

    try:
        out = mlp_classifier(x, params, single_buffer_weights=True)
    except Exception:
        # Fallback for jax builds without BlockSpec pipeline_mode support.
        out = mlp_classifier(x, params, single_buffer_weights=False)
    out = jax.block_until_ready(out)
    assert out.shape == (batch, num_classes)

    # Pure-JAX reference using the same bf16 operand casts as the kernel
    # (f32 accumulation), so the comparison isolates kernel correctness.
    xb = x.astype(jnp.bfloat16).astype(jnp.float32)
    w1b = w1.astype(jnp.bfloat16).astype(jnp.float32)
    w2b = w2.astype(jnp.bfloat16).astype(jnp.float32)
    h_ref = jnp.maximum(xb @ w1b + b1, 0.0)
    ref = h_ref.astype(jnp.bfloat16).astype(jnp.float32) @ w2b + b2
    assert jnp.allclose(out, ref, atol=1e-2, rtol=1e-2), (
        float(jnp.max(jnp.abs(out - ref))))

    print("KERNEL_OK")
</pallas_src>

<mosaic_0001>
module attributes {stable_mosaic.version = 11 : i64} {
  func.func @mlp_kernel(%arg0: i32, %arg1: memref<8x32xf32, #tpu.memory_space<vmem>>, %arg2: memref<32x128xbf16, #tpu.memory_space<vmem>>, %arg3: memref<1x128xf32, #tpu.memory_space<vmem>>, %arg4: memref<128x128xbf16, #tpu.memory_space<vmem>>, %arg5: memref<1x128xf32, #tpu.memory_space<vmem>>, %arg6: memref<8x128xf32, #tpu.memory_space<vmem>>) attributes {dimension_semantics = [#tpu.dimension_semantics<parallel>], iteration_bounds = array<i64: 1>, scalar_prefetch = 0 : i64, scratch_operands = 0 : i64, tpu.core_type = #tpu.core_type<tc>, window_params = [{transform_indices = @transform_0, window_bounds = array<i64: 8, 32>}, {pipeline_mode = #tpu.pipeline_mode<synchronous>, transform_indices = @transform_1, window_bounds = array<i64: 32, 128>}, {pipeline_mode = #tpu.pipeline_mode<synchronous>, transform_indices = @transform_2, window_bounds = array<i64: 1, 128>}, {pipeline_mode = #tpu.pipeline_mode<synchronous>, transform_indices = @transform_3, window_bounds = array<i64: 128, 128>}, {pipeline_mode = #tpu.pipeline_mode<synchronous>, transform_indices = @transform_4, window_bounds = array<i64: 1, 128>}, {transform_indices = @transform_5, window_bounds = array<i64: 8, 128>}]} {
    %c0 = arith.constant 0 : index
    %c0_0 = arith.constant 0 : index
    %0 = vector.load %arg1[%c0, %c0_0] : memref<8x32xf32, #tpu.memory_space<vmem>>, vector<8x32xf32>
    %1 = arith.truncf %0 : vector<8x32xf32> to vector<8x32xbf16>
    %c0_1 = arith.constant 0 : index
    %c0_2 = arith.constant 0 : index
    %2 = vector.load %arg2[%c0_1, %c0_2] : memref<32x128xbf16, #tpu.memory_space<vmem>>, vector<32x128xbf16>
    %cst = arith.constant dense<0.000000e+00> : vector<8x128xf32>
    %3 = tpu.matmul %1, %2, %cst {dimension_numbers = #tpu.dot_dimension_numbers<[1], [0], [0], [1], [0, 0, 1, 1], [], []>} : vector<8x32xbf16>, vector<32x128xbf16>, vector<8x128xf32> -> vector<8x128xf32>
    %c0_3 = arith.constant 0 : index
    %c0_4 = arith.constant 0 : index
    %4 = vector.load %arg3[%c0_3, %c0_4] : memref<1x128xf32, #tpu.memory_space<vmem>>, vector<1x128xf32>
    %5 = vector.broadcast %4 : vector<1x128xf32> to vector<8x128xf32>
    %6 = arith.addf %3, %5 : vector<8x128xf32>
    %cst_5 = arith.constant 0.000000e+00 : f32
    %7 = vector.broadcast %cst_5 : f32 to vector<8x128xf32>
    %8 = arith.maximumf %6, %7 : vector<8x128xf32>
    %9 = arith.truncf %8 : vector<8x128xf32> to vector<8x128xbf16>
    %c0_6 = arith.constant 0 : index
    %c0_7 = arith.constant 0 : index
    %10 = vector.load %arg4[%c0_6, %c0_7] : memref<128x128xbf16, #tpu.memory_space<vmem>>, vector<128x128xbf16>
    %cst_8 = arith.constant dense<0.000000e+00> : vector<8x128xf32>
    %11 = tpu.matmul %9, %10, %cst_8 {dimension_numbers = #tpu.dot_dimension_numbers<[1], [0], [0], [1], [0, 0, 1, 1], [], []>} : vector<8x128xbf16>, vector<128x128xbf16>, vector<8x128xf32> -> vector<8x128xf32>
    %c0_9 = arith.constant 0 : index
    %c0_10 = arith.constant 0 : index
    %12 = vector.load %arg5[%c0_9, %c0_10] : memref<1x128xf32, #tpu.memory_space<vmem>>, vector<1x128xf32>
    %13 = vector.broadcast %12 : vector<1x128xf32> to vector<8x128xf32>
    %14 = arith.addf %11, %13 : vector<8x128xf32>
    %c0_11 = arith.constant 0 : index
    %c0_12 = arith.constant 0 : index
    %15 = vector.load %arg6[%c0_11, %c0_12] : memref<8x128xf32, #tpu.memory_space<vmem>>, vector<8x128xf32>
    tpu.vector_store %arg6[%c0_11, %c0_12], %14 {strides = array<i32>} : memref<8x128xf32, #tpu.memory_space<vmem>>, vector<8x128xf32>,
    return
  }
  func.func @transform_0(%arg0: i32) -> (i32, i32) {
    %c0_i32 = arith.constant 0 : i32
    %c0_i32_0 = arith.constant 0 : i32
    return %arg0, %c0_i32 : i32, i32
  }
  func.func @transform_1(%arg0: i32) -> (i32, i32) {
    %c0_i32 = arith.constant 0 : i32
    %c0_i32_0 = arith.constant 0 : i32
    %c0_i32_1 = arith.constant 0 : i32
    return %c0_i32, %c0_i32_0 : i32, i32
  }
  func.func @transform_2(%arg0: i32) -> (i32, i32) {
    %c0_i32 = arith.constant 0 : i32
    %c0_i32_0 = arith.constant 0 : i32
    %c0_i32_1 = arith.constant 0 : i32
    return %c0_i32, %c0_i32_0 : i32, i32
  }
  func.func @transform_3(%arg0: i32) -> (i32, i32) {
    %c0_i32 = arith.constant 0 : i32
    %c0_i32_0 = arith.constant 0 : i32
    %c0_i32_1 = arith.constant 0 : i32
    return %c0_i32, %c0_i32_0 : i32, i32
  }
  func.func @transform_4(%arg0: i32) -> (i32, i32) {
    %c0_i32 = arith.constant 0 : i32
    %c0_i32_0 = arith.constant 0 : i32
    %c0_i32_1 = arith.constant 0 : i32
    return %c0_i32, %c0_i32_0 : i32, i32
  }
  func.func @transform_5(%arg0: i32) -> (i32, i32) {
    %c0_i32 = arith.constant 0 : i32
    %c0_i32_0 = arith.constant 0 : i32
    return %arg0, %c0_i32 : i32, i32
  }
}

module attributes {stable_mosaic.version = 11 : i64} {
  func.func @mlp_kernel(%arg0: i32, %arg1: memref<8x32xf32, #tpu.memory_space<vmem>>, %arg2: memref<32x128xbf16, #tpu.memory_space<vmem>>, %arg3: memref<1x128xf32, #tpu.memory_space<vmem>>, %arg4: memref<128x128xbf16, #tpu.memory_space<vmem>>, %arg5: memref<1x128xf32, #tpu.memory_space<vmem>>, %arg6: memref<8x128xf32, #tpu.memory_space<vmem>>) attributes {dimension_semantics = [#tpu.dimension_semantics<parallel>], iteration_bounds = array<i64: 1>, scalar_prefetch = 0 : i64, scratch_operands = 0 : i64, tpu.core_type = #tpu.core_type<tc>, window_params = [{transform_indices = @transform_0, window_bounds = array<i64: 8, 32>}, {pipeline_mode = #tpu.pipeline_mode<synchronous>, transform_indices = @transform_1, window_bounds = array<i64: 32, 128>}, {pipeline_mode = #tpu.pipeline_mode<synchronous>, transform_indices = @transform_2, window_bounds = array<i64: 1, 128>}, {pipeline_mode = #tpu.pipeline_mode<synchronous>, transform_indices = @transform_3, window_bounds = array<i64: 128, 128>}, {pipeline_mode = #tpu.pipeline_mode<synchronous>, transform_indices = @transform_4, window_bounds = array<i64: 1, 128>}, {transform_indices = @transform_5, window_bounds = array<i64: 8, 128>}]} {
    %c0 = arith.constant 0 : index
    %c0_0 = arith.constant 0 : index
    %0 = vector.load %arg1[%c0, %c0_0] : memref<8x32xf32, #tpu.memory_space<vmem>>, vector<8x32xf32>
    %1 = arith.truncf %0 : vector<8x32xf32> to vector<8x32xbf16>
    %c0_1 = arith.constant 0 : index
    %c0_2 = arith.constant 0 : index
    %2 = vector.load %arg2[%c0_1, %c0_2] : memref<32x128xbf16, #tpu.memory_space<vmem>>, vector<32x128xbf16>
    %cst = arith.constant dense<0.000000e+00> : vector<8x128xf32>
    %3 = tpu.matmul %1, %2, %cst {dimension_numbers = #tpu.dot_dimension_numbers<[1], [0], [0], [1], [0, 0, 1, 1], [], []>} : vector<8x32xbf16>, vector<32x128xbf16>, vector<8x128xf32> -> vector<8x128xf32>
    %c0_3 = arith.constant 0 : index
    %c0_4 = arith.constant 0 : index
    %4 = vector.load %arg3[%c0_3, %c0_4] : memref<1x128xf32, #tpu.memory_space<vmem>>, vector<1x128xf32>
    %5 = vector.broadcast %4 : vector<1x128xf32> to vector<8x128xf32>
    %6 = arith.addf %3, %5 : vector<8x128xf32>
    %cst_5 = arith.constant 0.000000e+00 : f32
    %7 = vector.broadcast %cst_5 : f32 to vector<8x128xf32>
    %8 = arith.maximumf %6, %7 : vector<8x128xf32>
    %9 = arith.truncf %8 : vector<8x128xf32> to vector<8x128xbf16>
    %c0_6 = arith.constant 0 : index
    %c0_7 = arith.constant 0 : index
    %10 = vector.load %arg4[%c0_6, %c0_7] : memref<128x128xbf16, #tpu.memory_space<vmem>>, vector<128x128xbf16>
    %cst_8 = arith.constant dense<0.000000e+00> : vector<8x128xf32>
    %11 = tpu.matmul %9, %10, %cst_8 {dimension_numbers = #tpu.dot_dimension_numbers<[1], [0], [0], [1], [0, 0, 1, 1], [], []>} : vector<8x128xbf16>, vector<128x128xbf16>, vector<8x128xf32> -> vector<8x128xf32>
    %c0_9 = arith.constant 0 : index
    %c0_10 = arith.constant 0 : index
    %12 = vector.load %arg5[%c0_9, %c0_10] : memref<1x128xf32, #tpu.memory_space<vmem>>, vector<1x128xf32>
    %13 = vector.broadcast %12 : vector<1x128xf32> to vector<8x128xf32>
    %14 = arith.addf %11, %13 : vector<8x128xf32>
    %c0_11 = arith.constant 0 : index
    %c0_12 = arith.constant 0 : index
    %15 = vector.load %arg6[%c0_11, %c0_12] : memref<8x128xf32, #tpu.memory_space<vmem>>, vector<8x128xf32>
    tpu.vector_store %arg6[%c0_11, %c0_12], %14 {strides = array<i32>} : memref<8x128xf32, #tpu.memory_space<vmem>>, vector<8x128xf32>,
    return
  }
  func.func @transform_0(%arg0: i32) -> (i32, i32) {
    %c0_i32 = arith.constant 0 : i32
    %c0_i32_0 = arith.constant 0 : i32
    return %arg0, %c0_i32 : i32, i32
  }
  func.func @transform_1(%arg0: i32) -> (i32, i32) {
    %c0_i32 = arith.constant 0 : i32
    %c0_i32_0 = arith.constant 0 : i32
    %c0_i32_1 = arith.constant 0 : i32
    return %c0_i32, %c0_i32_0 : i32, i32
  }
  func.func @transform_2(%arg0: i32) -> (i32, i32) {
    %c0_i32 = arith.constant 0 : i32
    %c0_i32_0 = arith.constant 0 : i32
    %c0_i32_1 = arith.constant 0 : i32
    return %c0_i32, %c0_i32_0 : i32, i32
  }
  func.func @transform_3(%arg0: i32) -> (i32, i32) {
    %c0_i32 = arith.constant 0 : i32
    %c0_i32_0 = arith.constant 0 : i32
    %c0_i32_1 = arith.constant 0 : i32
    return %c0_i32, %c0_i32_0 : i32, i32
  }
  func.func @transform_4(%arg0: i32) -> (i32, i32) {
    %c0_i32 = arith.constant 0 : i32
    %c0_i32_0 = arith.constant 0 : i32
    %c0_i32_1 = arith.constant 0 : i32
    return %c0_i32, %c0_i32_0 : i32, i32
  }
  func.func @transform_5(%arg0: i32) -> (i32, i32) {
    %c0_i32 = arith.constant 0 : i32
    %c0_i32_0 = arith.constant 0 : i32
    return %arg0, %c0_i32 : i32, i32
  }
}

</mosaic_0001>

<bundles_post_ra>
// kernel: tpu_custom_call.1
= control target key start
LH: loop header
LB: loop body
LE: loop exit
PB: predicated region body
PF: predicated region fallthrough
CT: control target
= control target key end

     0   :  { %10 = vsyncpa [#allocation3], 0  ;;  %s473_s0 = inlined_call_operand.hbm [shape: f32[8,32], index: 0, kind: input, shape index: {}]   ;;  %s474_s1 = inlined_call_operand.hbm [shape: bf16[32,128], index: 1, kind: input, shape index: {}]   ;;  %s475_s2 = inlined_call_operand.vmem [shape: f32[1,128], index: 2, kind: input, shape index: {}]   ;;  %s476_s3 = inlined_call_operand.hbm [shape: bf16[128,128], index: 3, kind: input, shape index: {}]   ;;  %s477_s4 = inlined_call_operand.vmem [shape: f32[1,128], index: 4, kind: input, shape index: {}]   ;;  %s478_s5 = inlined_call_operand.hbm [shape: f32[8,128], index: 5, kind: output, shape index: {}]  }
   0x1   :  { %11 = vsyncpa [#allocation6], 0 }
   0x2   :  { %12 = vsyncpa [#allocation4], 0  ;;  %s417_s18 = smov [#allocation5]  }
   0x3   :  { %s28_s19 = sshll.u32 %s417_s18, 4  ;;  %s29_s19 = int_to_ptr.vmem [resolvable:$true] %s28_s19 }
   0x4   :  { %s339_s20 = scalar_lea.vmem %s29_s19, 256  ;;  %p344_p1 = scmp.lt.s32.totalorder %s29_s19, %s29_s19 }
   0x5   :  { %p340_p0 = scmp.ne.s32.totalorder %s29_s19, %s339_s20  ;;  %p345_p2 = scmp.lt.s32.totalorder %s339_s20, %s339_s20 }
   0x7   :  { %p346_p3 = por %p345_p2, %p344_p1 }
   0x9   :  { %p347_p4 = pnand %p346_p3, %p340_p0 }
   0xb   :  { %350 = shalt.err (!%p347_p4)
}
   0xc   :  { %s418_s21 = smov 64   ;;  %s419_s22 = smov 4  }
   0xd   :  { %34 = dma.hbm_to_vmem [thread:$0]  %s474_s1, 256, %s29_s19, [#allocation6], %s418_s21, %s418_s21, %s419_s22  }
   0xe   :  { %s420_s25 = smov [#allocation2]   ;;  %s421_s27 = smov [#allocation7]  }
   0xf   :  { %s19_s26 = sshll.u32 %s420_s25, 4  ;;  %s42_s28 = sshll.u32 %s421_s27, 4  ;;  %s20_s26 = int_to_ptr.vmem [resolvable:$true] %s19_s26  ;;  %s43_s28 = int_to_ptr.vmem [resolvable:$true] %s42_s28 }
  0x10   :  { %s359_s29 = scalar_lea.vmem %s20_s26, 128  ;;  %p364_p6 = scmp.lt.s32.totalorder %s20_s26, %s20_s26 }
  0x11   :  { %p360_p5 = scmp.ne.s32.totalorder %s20_s26, %s359_s29  ;;  %p365_p7 = scmp.lt.s32.totalorder %s359_s29, %s359_s29 }
  0x13   :  { %p366_p8 = por %p365_p7, %p364_p6 }
  0x15   :  { %p367_p9 = pnand %p366_p8, %p360_p5 }
  0x17   :  { %370 = shalt.err (!%p367_p9)
}
  0x18   :  { %22 = dma.hbm_to_vmem [thread:$0]  %s473_s0, 128, %s20_s26, [#allocation3]  }
  0x19   :  { %s379_s7 = scalar_lea.vmem %s43_s28, 1024  ;;  %p384_p11 = scmp.lt.s32.totalorder %s43_s28, %s43_s28 }
  0x1a   :  { %p380_p10 = scmp.ne.s32.totalorder %s43_s28, %s379_s7  ;;  %p385_p12 = scmp.lt.s32.totalorder %s379_s7, %s379_s7 }
  0x1c   :  { %p386_p13 = por %p385_p12, %p384_p11 }
  0x1e   :  { %p387_p0 = pnand %p386_p13, %p380_p10 }
  0x20   :  { %390 = shalt.err (!%p387_p0)
}
  0x21   :  { %48 = dma.hbm_to_vmem [thread:$0]  %s476_s3, 1024, %s43_s28, [#allocation6], %s418_s21, %s418_s21, %s419_s22  }
  0x22   :  { %411 = dma.done.wait [#allocation3], 128  }
  0x23   :  { %412 = vsyncadd [#allocation3], 4294967168 }
  0x24   :  { %413 = dma.done.wait [#allocation6], 1280  }
  0x25   :  { %414 = vsyncadd [#allocation6], 4294966016  ;;  %v422_v0 = vmov 0.0   ;;  %vm423_vm0 = vmmov 0   ;;  %v321_v1 = vld [vmem:[#allocation5 + $0x8] sm:$0xff]   ;;  %v322_v2 = vld [vmem:[#allocation5] sm:$0xff]  }
  0x26   :  { %285 = vmatprep.subr.bf16.mxu0 %v422_v0  ;;  %289 = vmatprep.mubr.msk.bf16.mxu0 %vm423_vm0, %v422_v0  ;;  %v61_v3 = vld [vmem:[#allocation2] sm:$0xff]  ;;  %v323_v4 = vld [vmem:[#allocation7 + $0x38] sm:$0xff]   ;;  %v324_v6 = vld [vmem:[#allocation7 + $0x30] sm:$0xff]   ;;  %vm86_vm1 = vcmask 261120   ;;  %s424_s11 = smov [#allocation8]  }
  0x27   :  { %293 = vmatprep.subr.bf16.mxu1 %v422_v0  ;;  %309 = vmatprep.mubr.msk.bf16.mxu1 %vm423_vm0, %v422_v0  ;;  %v62_v5 = vpack.c.bf16 %v61_v3, %v61_v3  ;;  %v325_v7 = vld [vmem:[#allocation7 + $0x28] sm:$0xff]   ;;  %v326_v8 = vld [vmem:[#allocation7 + $0x20] sm:$0xff]   ;;  %v327_v9 = vld [vmem:[#allocation7 + $0x18] sm:$0xff]   ;;  %s250_s12 = sshll.u32 %s424_s11, 4  ;;  %s251_s12 = int_to_ptr.vmem [resolvable:$true] %s250_s12 }
  0x28   :  { %286 = vmatpush3.bf16.msra.mxu0 %v321_v1  ;;  %294 = vmatpush3.bf16.msra.mxu1 %v323_v4  ;;  %v328_v10 = vld [vmem:[#allocation7 + $0x10] sm:$0xff]   ;;  %v329_v11 = vld [vmem:[#allocation7 + $0x8] sm:$0xff]   ;;  %v330_v12 = vld [vmem:[#allocation7] sm:$0xff]   ;;  %p396_p2 = scmp.lt.s32.totalorder %s251_s12, %s251_s12 }
  0x29   :  { %287 = vmatprep.subr.bf16.mxu0 %v422_v0  ;;  %295 = vmatprep.subr.bf16.mxu1 %v422_v0  ;;  %v260_v13 = vld [vmem:[%s475_s2] ss:$0 sm:$0xff]  ;;  %s391_s2 = scalar_lea.vmem %s251_s12, 128 }
  0x2a   :  { %v264_v21 = vld [vmem:[%s477_s4] ss:$0 sm:$0xff]  ;;  %p392_p1 = scmp.ne.s32.totalorder %s251_s12, %s391_s2  ;;  %p397_p3 = scmp.lt.s32.totalorder %s391_s2, %s391_s2 }
  0x2c   :  { %288 = vmatpush3.bf16.msra.mxu0 %v322_v2  ;;  %296 = vmatpush3.bf16.msra.mxu1 %v324_v6  ;;  %p398_p4 = por %p397_p3, %p396_p2 }
  0x2d   :  { %297 = vmatprep.subr.bf16.mxu1 %v422_v0 }
  0x2e   :  { %p399_p5 = pnand %p398_p4, %p392_p1 }
  0x2f   :  { %290 = vmatmul.mubr.msk.bf16.vlgmr.msra.gmra.mxu0 %vm86_vm1, %v62_v5 }
  0x30   :  { %298 = vmatpush3.bf16.msra.mxu1 %v325_v7 }
  0x31   :  { %299 = vmatprep.subr.bf16.mxu1 %v422_v0 }
  0x34   :  { %300 = vmatpush3.bf16.msra.mxu1 %v326_v8 }
  0x35   :  { %301 = vmatprep.subr.bf16.mxu1 %v422_v0 }
  0x38   :  { %302 = vmatpush3.bf16.msra.mxu1 %v327_v9 }
  0x39   :  { %303 = vmatprep.subr.bf16.mxu1 %v422_v0 }
  0x3c   :  { %304 = vmatpush3.bf16.msra.mxu1 %v328_v10 }
  0x3d   :  { %305 = vmatprep.subr.bf16.mxu1 %v422_v0 }
  0x40   :  { %306 = vmatpush3.bf16.msra.mxu1 %v329_v11 }
  0x41   :  { %307 = vmatprep.subr.bf16.mxu1 %v422_v0 }
  0x44   :  { %308 = vmatpush3.bf16.msra.mxu1 %v330_v12 }
  0xef   :  { %v124_v14 = vpop.f32.mrf.mxu0 }
  0xf0   :  { %v125_v15 = vadd.f32 %v260_v13, %v124_v14 }
  0xf1   :  { %v291_v16 = vpop.f32.mrf.mxu0 }
  0xf2   :  { %v130_v17 = vmax.f32 %v125_v15, 0.0 }
  0xf3   :  { %v127_v18 = vpop.f32.mrf.mxu0 }
  0xf4   :  { %v131_v19 = vpack.c.bf16 %v130_v17, %v130_v17 }
  0xf5   :  { %v292_v20 = vpop.f32.mrf.mxu0 }
  0xf6   :  { %310 = vmatmul.mubr.bf16.vlgmr.msra.gmra.mxu1 %v131_v19 }
 0x1b6   :  { %v237_v22 = vpop.f32.mrf.mxu1 }
 0x1b7   :  { %v238_v23 = vadd.f32 %v264_v21, %v237_v22 }
 0x1b8   :  { %v311_v24 = vpop.f32.mrf.mxu1 }
 0x1b9   :  { %243 = vst [vmem:[#allocation8] sm:$0xff] %v238_v23 }
 0x1ba   :  { %v240_v25 = vpop.f32.mrf.mxu1 }
 0x1bb   :  { %402 = shalt.err (!%p399_p5)
}
 0x1bc   :  { %253 = dma.vmem_to_hbm [thread:$0]  %s251_s12, 128, %s478_s5, [#allocation4]   ;;  %v312_v26 = vpop.f32.mrf.mxu1 }
 0x1bd   :  { %415 = dma.done.wait [#allocation4], 128  }
 0x1be   :  { %416 = vsyncadd [#allocation4], 4294967168 }
 0x1bf   :  { %257 = vsyncpa [#allocation3], 1 }
 0x1c0   :  { %258 = vsyncpa [#allocation6], 1 }
 0x1c1   :  { %259 = vsyncpa [#allocation4], 1 }

// kernel: tpu_custom_call.1
= control target key start
LH: loop header
LB: loop body
LE: loop exit
PB: predicated region body
PF: predicated region fallthrough
CT: control target
= control target key end

     0   :  { %10 = vsyncpa [#allocation3], 0  ;;  %s473_s0 = inlined_call_operand.hbm [shape: f32[8,32], index: 0, kind: input, shape index: {}]   ;;  %s474_s1 = inlined_call_operand.hbm [shape: bf16[32,128], index: 1, kind: input, shape index: {}]   ;;  %s475_s2 = inlined_call_operand.vmem [shape: f32[1,128], index: 2, kind: input, shape index: {}]   ;;  %s476_s3 = inlined_call_operand.hbm [shape: bf16[128,128], index: 3, kind: input, shape index: {}]   ;;  %s477_s4 = inlined_call_operand.vmem [shape: f32[1,128], index: 4, kind: input, shape index: {}]   ;;  %s478_s5 = inlined_call_operand.hbm [shape: f32[8,128], index: 5, kind: output, shape index: {}]  }
   0x1   :  { %11 = vsyncpa [#allocation6], 0 }
   0x2   :  { %12 = vsyncpa [#allocation4], 0  ;;  %s417_s18 = smov [#allocation5]  }
   0x3   :  { %s28_s19 = sshll.u32 %s417_s18, 4  ;;  %s29_s19 = int_to_ptr.vmem [resolvable:$true] %s28_s19 }
   0x4   :  { %s339_s20 = scalar_lea.vmem %s29_s19, 256  ;;  %p344_p1 = scmp.lt.s32.totalorder %s29_s19, %s29_s19 }
   0x5   :  { %p340_p0 = scmp.ne.s32.totalorder %s29_s19, %s339_s20  ;;  %p345_p2 = scmp.lt.s32.totalorder %s339_s20, %s339_s20 }
   0x7   :  { %p346_p3 = por %p345_p2, %p344_p1 }
   0x9   :  { %p347_p4 = pnand %p346_p3, %p340_p0 }
   0xb   :  { %350 = shalt.err (!%p347_p4)
}
   0xc   :  { %s418_s21 = smov 64   ;;  %s419_s22 = smov 4  }
   0xd   :  { %34 = dma.hbm_to_vmem [thread:$0]  %s474_s1, 256, %s29_s19, [#allocation6], %s418_s21, %s418_s21, %s419_s22  }
   0xe   :  { %s420_s25 = smov [#allocation2]   ;;  %s421_s27 = smov [#allocation7]  }
   0xf   :  { %s19_s26 = sshll.u32 %s420_s25, 4  ;;  %s42_s28 = sshll.u32 %s421_s27, 4  ;;  %s20_s26 = int_to_ptr.vmem [resolvable:$true] %s19_s26  ;;  %s43_s28 = int_to_ptr.vmem [resolvable:$true] %s42_s28 }
  0x10   :  { %s359_s29 = scalar_lea.vmem %s20_s26, 128  ;;  %p364_p6 = scmp.lt.s32.totalorder %s20_s26, %s20_s26 }
  0x11   :  { %p360_p5 = scmp.ne.s32.totalorder %s20_s26, %s359_s29  ;;  %p365_p7 = scmp.lt.s32.totalorder %s359_s29, %s359_s29 }
  0x13   :  { %p366_p8 = por %p365_p7, %p364_p6 }
  0x15   :  { %p367_p9 = pnand %p366_p8, %p360_p5 }
  0x17   :  { %370 = shalt.err (!%p367_p9)
}
  0x18   :  { %22 = dma.hbm_to_vmem [thread:$0]  %s473_s0, 128, %s20_s26, [#allocation3]  }
  0x19   :  { %s379_s7 = scalar_lea.vmem %s43_s28, 1024  ;;  %p384_p11 = scmp.lt.s32.totalorder %s43_s28, %s43_s28 }
  0x1a   :  { %p380_p10 = scmp.ne.s32.totalorder %s43_s28, %s379_s7  ;;  %p385_p12 = scmp.lt.s32.totalorder %s379_s7, %s379_s7 }
  0x1c   :  { %p386_p13 = por %p385_p12, %p384_p11 }
  0x1e   :  { %p387_p0 = pnand %p386_p13, %p380_p10 }
  0x20   :  { %390 = shalt.err (!%p387_p0)
}
  0x21   :  { %48 = dma.hbm_to_vmem [thread:$0]  %s476_s3, 1024, %s43_s28, [#allocation6], %s418_s21, %s418_s21, %s419_s22  }
  0x22   :  { %411 = dma.done.wait [#allocation3], 128  }
  0x23   :  { %412 = vsyncadd [#allocation3], 4294967168 }
  0x24   :  { %413 = dma.done.wait [#allocation6], 1280  }
  0x25   :  { %414 = vsyncadd [#allocation6], 4294966016  ;;  %v422_v0 = vmov 0.0   ;;  %vm423_vm0 = vmmov 0   ;;  %v321_v1 = vld [vmem:[#allocation5 + $0x8] sm:$0xff]   ;;  %v322_v2 = vld [vmem:[#allocation5] sm:$0xff]  }
  0x26   :  { %285 = vmatprep.subr.bf16.mxu0 %v422_v0  ;;  %289 = vmatprep.mubr.msk.bf16.mxu0 %vm423_vm0, %v422_v0  ;;  %v61_v3 = vld [vmem:[#allocation2] sm:$0xff]  ;;  %v323_v4 = vld [vmem:[#allocation7 + $0x38] sm:$0xff]   ;;  %v324_v6 = vld [vmem:[#allocation7 + $0x30] sm:$0xff]   ;;  %vm86_vm1 = vcmask 261120   ;;  %s424_s11 = smov [#allocation8]  }
  0x27   :  { %293 = vmatprep.subr.bf16.mxu1 %v422_v0  ;;  %309 = vmatprep.mubr.msk.bf16.mxu1 %vm423_vm0, %v422_v0  ;;  %v62_v5 = vpack.c.bf16 %v61_v3, %v61_v3  ;;  %v325_v7 = vld [vmem:[#allocation7 + $0x28] sm:$0xff]   ;;  %v326_v8 = vld [vmem:[#allocation7 + $0x20] sm:$0xff]   ;;  %v327_v9 = vld [vmem:[#allocation7 + $0x18] sm:$0xff]   ;;  %s250_s12 = sshll.u32 %s424_s11, 4  ;;  %s251_s12 = int_to_ptr.vmem [resolvable:$true] %s250_s12 }
  0x28   :  { %286 = vmatpush3.bf16.msra.mxu0 %v321_v1  ;;  %294 = vmatpush3.bf16.msra.mxu1 %v323_v4  ;;  %v328_v10 = vld [vmem:[#allocation7 + $0x10] sm:$0xff]   ;;  %v329_v11 = vld [vmem:[#allocation7 + $0x8] sm:$0xff]   ;;  %v330_v12 = vld [vmem:[#allocation7] sm:$0xff]   ;;  %p396_p2 = scmp.lt.s32.totalorder %s251_s12, %s251_s12 }
  0x29   :  { %287 = vmatprep.subr.bf16.mxu0 %v422_v0  ;;  %295 = vmatprep.subr.bf16.mxu1 %v422_v0  ;;  %v260_v13 = vld [vmem:[%s475_s2] ss:$0 sm:$0xff]  ;;  %s391_s2 = scalar_lea.vmem %s251_s12, 128 }
  0x2a   :  { %v264_v21 = vld [vmem:[%s477_s4] ss:$0 sm:$0xff]  ;;  %p392_p1 = scmp.ne.s32.totalorder %s251_s12, %s391_s2  ;;  %p397_p3 = scmp.lt.s32.totalorder %s391_s2, %s391_s2 }
  0x2c   :  { %288 = vmatpush3.bf16.msra.mxu0 %v322_v2  ;;  %296 = vmatpush3.bf16.msra.mxu1 %v324_v6  ;;  %p398_p4 = por %p397_p3, %p396_p2 }
  0x2d   :  { %297 = vmatprep.subr.bf16.mxu1 %v422_v0 }
  0x2e   :  { %p399_p5 = pnand %p398_p4, %p392_p1 }
  0x2f   :  { %290 = vmatmul.mubr.msk.bf16.vlgmr.msra.gmra.mxu0 %vm86_vm1, %v62_v5 }
  0x30   :  { %298 = vmatpush3.bf16.msra.mxu1 %v325_v7 }
  0x31   :  { %299 = vmatprep.subr.bf16.mxu1 %v422_v0 }
  0x34   :  { %300 = vmatpush3.bf16.msra.mxu1 %v326_v8 }
  0x35   :  { %301 = vmatprep.subr.bf16.mxu1 %v422_v0 }
  0x38   :  { %302 = vmatpush3.bf16.msra.mxu1 %v327_v9 }
  0x39   :  { %303 = vmatprep.subr.bf16.mxu1 %v422_v0 }
  0x3c   :  { %304 = vmatpush3.bf16.msra.mxu1 %v328_v10 }
  0x3d   :  { %305 = vmatprep.subr.bf16.mxu1 %v422_v0 }
  0x40   :  { %306 = vmatpush3.bf16.msra.mxu1 %v329_v11 }
  0x41   :  { %307 = vmatprep.subr.bf16.mxu1 %v422_v0 }
  0x44   :  { %308 = vmatpush3.bf16.msra.mxu1 %v330_v12 }
  0xef   :  { %v124_v14 = vpop.f32.mrf.mxu0 }
  0xf0   :  { %v125_v15 = vadd.f32 %v260_v13, %v124_v14 }
  0xf1   :  { %v291_v16 = vpop.f32.mrf.mxu0 }
  0xf2   :  { %v130_v17 = vmax.f32 %v125_v15, 0.0 }
  0xf3   :  { %v127_v18 = vpop.f32.mrf.mxu0 }
  0xf4   :  { %v131_v19 = vpack.c.bf16 %v130_v17, %v130_v17 }
  0xf5   :  { %v292_v20 = vpop.f32.mrf.mxu0 }
  0xf6   :  { %310 = vmatmul.mubr.bf16.vlgmr.msra.gmra.mxu1 %v131_v19 }
 0x1b6   :  { %v237_v22 = vpop.f32.mrf.mxu1 }
 0x1b7   :  { %v238_v23 = vadd.f32 %v264_v21, %v237_v22 }
 0x1b8   :  { %v311_v24 = vpop.f32.mrf.mxu1 }
 0x1b9   :  { %243 = vst [vmem:[#allocation8] sm:$0xff] %v238_v23 }
 0x1ba   :  { %v240_v25 = vpop.f32.mrf.mxu1 }
 0x1bb   :  { %402 = shalt.err (!%p399_p5)
}
 0x1bc   :  { %253 = dma.vmem_to_hbm [thread:$0]  %s251_s12, 128, %s478_s5, [#allocation4]   ;;  %v312_v26 = vpop.f32.mrf.mxu1 }
 0x1bd   :  { %415 = dma.done.wait [#allocation4], 128  }
 0x1be   :  { %416 = vsyncadd [#allocation4], 4294967168 }
 0x1bf   :  { %257 = vsyncpa [#allocation3], 1 }
 0x1c0   :  { %258 = vsyncpa [#allocation6], 1 }
 0x1c1   :  { %259 = vsyncpa [#allocation4], 1 }

</bundles_post_ra>
